<compile_context>
chip_gen: v6e
topology: v6e:2x2x1
jax: 0.10.0
libtpu: 0.0.40
codegen_flags: <defaults>
</compile_context>

<pallas_src>
import functools

import jax
import jax.numpy as jnp
from jax.experimental import pallas as pl
from jax.experimental.pallas import tpu as pltpu


def _bilinear_matrix(out_size, in_size):
    """M (out, in) s.t. y = M @ x matches torch bilinear, align_corners=True (1-D)."""
    scale = (in_size - 1) / (out_size - 1) if out_size > 1 else 0.0
    idx = jnp.arange(out_size, dtype=jnp.float32)
    src = idx * scale
    lo = jnp.clip(jnp.floor(src).astype(jnp.int32), 0, in_size - 1)
    hi = jnp.clip(lo + 1, 0, in_size - 1)
    w_hi = src - lo.astype(jnp.float32)
    w_lo = 1.0 - w_hi
    rows = jnp.arange(out_size)
    mat = jnp.zeros((out_size, in_size), dtype=jnp.float32)
    mat = mat.at[rows, lo].add(w_lo)
    mat = mat.at[rows, hi].add(w_hi)
    return mat


def _silog_kernel(*refs, rows, cols, blk_b, has_mask, do_interp, ragged):
    idx = 0
    if do_interp:
        kt_ref = refs[idx]; idx += 1
    x_ref = refs[idx]; idx += 1
    t_ref = refs[idx]; idx += 1
    m_ref = None
    if has_mask:
        m_ref = refs[idx]; idx += 1
    out_ref = refs[idx]

    # native-dtype HBM streams, cast to f32 on the VPU (log inputs stay f32)
    x = x_ref[...].astype(jnp.float32)
    if do_interp:
        # bilinear upsample of every row in this block = one MXU matmul
        up = jnp.dot(x, kt_ref[...], preferred_element_type=jnp.float32)
    else:
        up = x
    t = t_ref[...].astype(jnp.float32)

    # fused transcendental: log(up) - log(t) -> log(up / t); one EUP log/element
    g = jnp.log(up / t)

    valid = None
    if ragged:
        # only needed when ROWS % B != 0: row-only (B, 1) condition, broadcast
        base = pl.program_id(0) * blk_b
        row = jax.lax.broadcasted_iota(jnp.int32, (blk_b, 1), 0) + base
        valid = row < rows
    if has_mask:
        mv = m_ref[...].astype(jnp.float32) > 0.0
        valid = mv if valid is None else jnp.logical_and(valid, mv)

    if valid is not None:
        # select (NOT multiply): masked-out / padded entries may be inf/NaN
        g = jnp.where(valid, g, 0.0)

    if has_mask:
        cnt = jnp.sum(valid.astype(jnp.float32))
    elif ragged:
        nrows = jnp.minimum(jnp.int32(blk_b),
                            jnp.int32(rows) - pl.program_id(0) * blk_b)
        cnt = nrows.astype(jnp.float32) * jnp.float32(cols)
    else:
        cnt = jnp.float32(blk_b * cols)

    # block sum + mean-shifted second moment (stable parallel-variance combine)
    s = jnp.sum(g)
    mean_b = s / jnp.maximum(cnt, 1.0)
    dev = g - mean_b
    d2 = dev * dev
    if valid is not None:
        d2 = jnp.where(valid, d2, 0.0)
    m2 = jnp.sum(d2)

    # rows 0/1/2 of this step's (8,128) output tile carry (s, m2, cnt)
    r = jax.lax.broadcasted_iota(jnp.int32, (8, 128), 0)
    tile = jnp.where(r == 0, s,
           jnp.where(r == 1, m2,
           jnp.where(r == 2, cnt, 0.0)))
    out_ref[0] = tile


def silog_loss(inp, target, mask=None, interpolate=True):
    """Pallas implementation of SILogLoss.forward (NCHW layout)."""
    N, C, Hin, Win = inp.shape
    _, _, H, W = target.shape
    NC = N * C
    HW = H * W
    KIN = Hin * Win
    has_mask = mask is not None

    need_interp = bool(interpolate) and (Hin, Win) != (H, W)
    if not need_interp:
        assert (Hin, Win) == (H, W), "input/target spatial sizes must match"

    KT_LIMIT = 4 * 1024 * 1024          # max bytes for the fused Kronecker matrix
    do_interp = False
    kt = None
    if need_interp:
        wh = _bilinear_matrix(H, Hin)                    # (H, Hin)
        ww = _bilinear_matrix(W, Win)                    # (W, Win)
        if KIN * HW * 4 <= KT_LIMIT:
            # kron(Wh, Ww)^T :  KT[i*Win + j, h*W + w] = Wh[h, i] * Ww[w, j]
            kt = jnp.einsum('hi,wj->ijhw', wh, ww).reshape(KIN, HW)
            do_interp = True

    if need_interp and not do_interp:
        # Separable bilinear (two small matmuls) in the wrapper for large images:
        # avoids the O(Hin*Win*H*W) Kronecker FLOPs / VMEM that do not scale.
        # TODO(synk): fuse the separable  up = Wh @ x_img @ Ww^T  into the kernel
        # to avoid this extra HBM round trip of `up` for very large images.
        xf = inp.reshape(NC, Hin, Win).astype(jnp.float32)
        t1 = jnp.einsum('nhw,Ww->nhW', xf, ww)           # (NC, Hin, W)
        x_src = jnp.einsum('Hh,nhW->nHW', wh, t1).reshape(NC, HW)
    elif do_interp:
        x_src = inp.reshape(NC, KIN)                     # native dtype
    else:
        x_src = inp.reshape(NC, HW)                      # native dtype

    # pack several small images per slab row so the x DMA / MXU K are lane-dense
    k_pack = 1
    if do_interp and KIN < 128:
        for k in range(max(1, 128 // KIN), 1, -1):
            if (NC % k == 0 and NC // k >= 8
                    and (k * KIN) * (k * HW) * 4 <= 2 * KT_LIMIT):
                k_pack = k
                break
        if k_pack > 1:
            kt = jnp.kron(jnp.eye(k_pack, dtype=kt.dtype), kt)   # block-diagonal

    ROWS = NC // k_pack
    cols_in = (k_pack * KIN) if do_interp else HW
    cols_out = k_pack * HW

    x = x_src.reshape(ROWS, cols_in)
    t = target.reshape(ROWS, cols_out)                   # native dtype
    m = None
    if has_mask:
        if mask.shape != target.shape:
            # TODO(synk): stream broadcast-dim masks without materializing copies.
            mask = jnp.broadcast_to(mask, target.shape)
        m = (mask != 0).astype(jnp.int8).reshape(ROWS, cols_out)   # compact stream

    # ---- generation-aware VMEM budget / block size ----
    x_item = jnp.dtype(x.dtype).itemsize
    t_item = jnp.dtype(t.dtype).itemsize
    kt_bytes = int(kt.size) * 4 if do_interp else 0

    try:
        vmem_cap = int(getattr(pltpu.get_tpu_info(), "vmem_capacity_bytes",
                               64 * 1024 * 1024))
    except Exception:
        vmem_cap = 64 * 1024 * 1024
    if vmem_cap >= 96 * 1024 * 1024:        # v5e / v6e: 128 MiB VMEM
        block_budget = 40 * 1024 * 1024
        vmem_limit = 96 * 1024 * 1024
        b_cap = 2048
    else:                                   # v7x: 64 MiB VMEM per TensorCore
        block_budget = 18 * 1024 * 1024
        vmem_limit = 48 * 1024 * 1024
        b_cap = 1024

    # per-row VMEM: double-buffered input streams + single-buffered KT +
    # ~4 live (B, cols_out) f32 temporaries (up, g, dev, d2) + the f32 x cast
    stream_row = 2 * (cols_in * x_item + cols_out * t_item
                      + (cols_out if has_mask else 0))
    interm_row = 4 * (cols_in + 4 * cols_out)
    row_bytes = stream_row + interm_row
    usable = max(block_budget - kt_bytes, 8 * row_bytes)
    B = int(min(usable // row_bytes, b_cap))
    if B >= ROWS:
        B = ROWS                                   # one block covers all rows
    elif B >= 256:
        B = B // 256 * 256                         # full MXU / lane-dense tiles
    else:
        B = max(32, B // 32 * 32)                  # int8-mask tile granularity
    G = (ROWS + B - 1) // B
    ragged = (ROWS % B) != 0

    kernel = functools.partial(
        _silog_kernel, rows=ROWS, cols=cols_out, blk_b=B,
        has_mask=has_mask, do_interp=do_interp, ragged=ragged)

    flops = (2 * ROWS * cols_in * cols_out if do_interp else 0) + 8 * NC * HW
    bytes_acc = (x.size * x_item + t.size * t_item
                 + (m.size if has_mask else 0) + kt_bytes + G * 8 * 128 * 4)
    cost = pl.CostEstimate(flops=int(flops), transcendentals=2 * NC * HW,
                           bytes_accessed=int(bytes_acc))

    def _call(kt_single_buffered):
        in_specs = []
        inputs = []
        if do_interp:
            if kt_single_buffered:
                # constant index_map -> double-buffering KT is pure VMEM waste
                kt_spec = pl.BlockSpec(kt.shape, lambda i: (0, 0),
                                       pipeline_mode=pl.Buffered(1))
            else:
                kt_spec = pl.BlockSpec(kt.shape, lambda i: (0, 0))
            in_specs.append(kt_spec)
            inputs.append(kt)
        in_specs.append(pl.BlockSpec((B, cols_in), lambda i: (i, 0)))
        inputs.append(x)
        in_specs.append(pl.BlockSpec((B, cols_out), lambda i: (i, 0)))
        inputs.append(t)
        if has_mask:
            in_specs.append(pl.BlockSpec((B, cols_out), lambda i: (i, 0)))
            inputs.append(m)
        return pl.pallas_call(
            kernel,
            out_shape=jax.ShapeDtypeStruct((G, 8, 128), jnp.float32),
            grid_spec=pltpu.PrefetchScalarGridSpec(
                num_scalar_prefetch=0,
                grid=(G,),
                in_specs=in_specs,
                out_specs=pl.BlockSpec((1, 8, 128), lambda i: (i, 0, 0)),
            ),
            # TODO(synk): on v7x, switch this axis to pltpu.CORE_PARALLEL if a
            # profile shows one TensorCore idle; per-step output tiles are
            # already independent so the change is drop-in.
            compiler_params=pltpu.CompilerParams(
                dimension_semantics=("parallel",),
                vmem_limit_bytes=vmem_limit),
            cost_estimate=cost,
        )(*inputs)

    if do_interp:
        try:
            parts = _call(True)
        except Exception:      # fall back if BlockSpec pipeline_mode unsupported
            parts = _call(False)
    else:
        parts = _call(False)

    # stable combine of per-block (sum, mean-shifted M2, count) around the
    # global mean:  M2_total = sum_b [ M2_b + n_b * (mean_b - mu)^2 ]
    s_b = parts[:, 0, 0]
    m2_b = parts[:, 1, 0]
    n_b = parts[:, 2, 0]
    n = jnp.sum(n_b)
    mu = jnp.sum(s_b) / n
    mean_b = s_b / jnp.maximum(n_b, 1.0)
    m2 = jnp.sum(m2_b + n_b * jnp.square(mean_b - mu))
    # torch.var default is unbiased (divide by n - 1); n <= 1 gives inf/NaN like torch.
    var = m2 / (n - 1.0)
    dg = var + 0.15 * mu * mu
    return 10.0 * jnp.sqrt(jnp.maximum(dg, 0.0))


def _silog_loss_ref(inp, target, mask=None):
    """Pure-JAX reference for correctness check."""
    N, C, Hin, Win = inp.shape
    _, _, H, W = target.shape
    wh = _bilinear_matrix(H, Hin)
    ww = _bilinear_matrix(W, Win)
    up = jnp.einsum('hi,ncij,wj->nchw', wh, inp.astype(jnp.float32), ww)
    g = jnp.log(up) - jnp.log(target.astype(jnp.float32))
    if mask is None:
        n = g.size
        mean = jnp.mean(g)
        var = jnp.var(g) * n / (n - 1)                   # unbiased, like torch.var
    else:
        m = mask.astype(jnp.float32)
        n = jnp.sum(m)
        mean = jnp.sum(g * m) / n
        var = jnp.sum(((g - mean) ** 2) * m) / (n - 1.0)
    dg = var + 0.15 * mean ** 2
    return 10.0 * jnp.sqrt(dg)


if __name__ == "__main__":
    key = jax.random.PRNGKey(0)
    k1, k2, k3, k4 = jax.random.split(key, 4)
    N, C, Hin, Win, H, W = 2, 8, 8, 8, 16, 16
    # strictly positive inputs (log is taken)
    inp = jax.random.uniform(k1, (N, C, Hin, Win), jnp.float32,
                             minval=0.2, maxval=2.0)
    target = jax.random.uniform(k2, (N, C, H, W), jnp.float32,
                                minval=0.2, maxval=2.0)

    # interpolated, mask=None (no mask streamed from HBM; packed Kron matmul)
    loss = jax.block_until_ready(silog_loss(inp, target, mask=None,
                                            interpolate=True))
    ref = _silog_loss_ref(inp, target)
    assert jnp.allclose(loss, ref, rtol=1e-4, atol=1e-4), (loss, ref)

    # interpolated + boolean mask (compact int8 stream)
    mask = jax.random.bernoulli(k3, 0.6, (N, C, H, W))
    loss_m = jax.block_until_ready(silog_loss(inp, target, mask=mask,
                                              interpolate=True))
    ref_m = _silog_loss_ref(inp, target, mask)
    assert jnp.allclose(loss_m, ref_m, rtol=1e-4, atol=1e-4), (loss_m, ref_m)

    # input already at target resolution (no-interp kernel path)
    inp_same = jax.random.uniform(k4, (N, C, H, W), jnp.float32,
                                  minval=0.2, maxval=2.0)
    loss_s = jax.block_until_ready(silog_loss(inp_same, target, mask=None,
                                              interpolate=True))
    ref_s = _silog_loss_ref(inp_same, target)
    assert jnp.allclose(loss_s, ref_s, rtol=1e-4, atol=1e-4), (loss_s, ref_s)

    print("KERNEL_OK")
</pallas_src>

<mosaic_0001>
module attributes {stable_mosaic.version = 11 : i64} {
  func.func @_silog_kernel(%arg0: i32, %arg1: memref<128x512xf32, #tpu.memory_space<vmem>>, %arg2: memref<8x128xf32, #tpu.memory_space<vmem>>, %arg3: memref<8x512xf32, #tpu.memory_space<vmem>>, %arg4: memref<1x8x128xf32, #tpu.memory_space<vmem>>) attributes {dimension_semantics = [#tpu.dimension_semantics<parallel>], iteration_bounds = array<i64: 1>, scalar_prefetch = 0 : i64, scratch_operands = 0 : i64, tpu.core_type = #tpu.core_type<tc>, window_params = [{pipeline_mode = #tpu.pipeline_mode<synchronous>, transform_indices = @transform_0, window_bounds = array<i64: 128, 512>}, {transform_indices = @transform_1, window_bounds = array<i64: 8, 128>}, {transform_indices = @transform_2, window_bounds = array<i64: 8, 512>}, {transform_indices = @transform_3, window_bounds = array<i64: 1, 8, 128>}]} {
    %c0 = arith.constant 0 : index
    %c0_0 = arith.constant 0 : index
    %0 = vector.load %arg2[%c0, %c0_0] : memref<8x128xf32, #tpu.memory_space<vmem>>, vector<8x128xf32>
    %c0_1 = arith.constant 0 : index
    %c0_2 = arith.constant 0 : index
    %1 = vector.load %arg1[%c0_1, %c0_2] : memref<128x512xf32, #tpu.memory_space<vmem>>, vector<128x512xf32>
    %cst = arith.constant dense<0.000000e+00> : vector<8x512xf32>
    %2 = tpu.matmul %0, %1, %cst {dimension_numbers = #tpu.dot_dimension_numbers<[1], [0], [0], [1], [0, 0, 1, 1], [], []>} : vector<8x128xf32>, vector<128x512xf32>, vector<8x512xf32> -> vector<8x512xf32>
    %c0_3 = arith.constant 0 : index
    %c0_4 = arith.constant 0 : index
    %3 = vector.load %arg3[%c0_3, %c0_4] : memref<8x512xf32, #tpu.memory_space<vmem>>, vector<8x512xf32>
    %4 = arith.divf %2, %3 : vector<8x512xf32>
    %5 = math.log %4 : vector<8x512xf32>
    %6 = vector.shape_cast %5 : vector<8x512xf32> to vector<1x8x512xf32>
    %cst_5 = arith.constant dense<0.000000e+00> : vector<1xf32>
    %7 = vector.multi_reduction <add>, %6, %cst_5 [1, 2] : vector<1x8x512xf32> to vector<1xf32>
    %8 = vector.shape_cast %7 : vector<1xf32> to vector<1x1x1xf32>
    %9 = vector.extract %8[0, 0, 0] : f32 from vector<1x1x1xf32>
    %cst_6 = arith.constant 4.096000e+03 : f32
    %cst_7 = arith.constant 1.000000e+00 : f32
    %10 = arith.maximumf %cst_6, %cst_7 : f32
    %11 = arith.divf %9, %10 : f32
    %12 = vector.broadcast %11 : f32 to vector<8x512xf32>
    %13 = arith.subf %5, %12 : vector<8x512xf32>
    %14 = arith.mulf %13, %13 : vector<8x512xf32>
    %15 = vector.shape_cast %14 : vector<8x512xf32> to vector<1x8x512xf32>
    %cst_8 = arith.constant dense<0.000000e+00> : vector<1xf32>
    %16 = vector.multi_reduction <add>, %15, %cst_8 [1, 2] : vector<1x8x512xf32> to vector<1xf32>
    %17 = vector.shape_cast %16 : vector<1xf32> to vector<1x1x1xf32>
    %18 = vector.extract %17[0, 0, 0] : f32 from vector<1x1x1xf32>
    %19 = tpu.iota {dimensions = array<i32: 0>} : vector<8x128xi32>
    %c0_i32 = arith.constant 0 : i32
    %20 = vector.broadcast %c0_i32 : i32 to vector<8x128xi32>
    %21 = arith.cmpi eq, %19, %20 : vector<8x128xi32>
    %c1_i32 = arith.constant 1 : i32
    %22 = vector.broadcast %c1_i32 : i32 to vector<8x128xi32>
    %23 = arith.cmpi eq, %19, %22 : vector<8x128xi32>
    %c2_i32 = arith.constant 2 : i32
    %24 = vector.broadcast %c2_i32 : i32 to vector<8x128xi32>
    %25 = arith.cmpi eq, %19, %24 : vector<8x128xi32>
    %cst_9 = arith.constant 4.096000e+03 : f32
    %cst_10 = arith.constant 0.000000e+00 : f32
    %26 = vector.broadcast %cst_9 : f32 to vector<8x128xf32>
    %27 = vector.broadcast %cst_10 : f32 to vector<8x128xf32>
    %28 = arith.select %25, %26, %27 : vector<8x128xi1>, vector<8x128xf32>
    %29 = vector.broadcast %18 : f32 to vector<8x128xf32>
    %30 = arith.select %23, %29, %28 : vector<8x128xi1>, vector<8x128xf32>
    %31 = vector.broadcast %9 : f32 to vector<8x128xf32>
    %32 = arith.select %21, %31, %30 : vector<8x128xi1>, vector<8x128xf32>
    %c0_11 = arith.constant 0 : index
    %c0_12 = arith.constant 0 : index
    %c0_13 = arith.constant 0 : index
    %33 = vector.load %arg4[%c0_11, %c0_12, %c0_13] : memref<1x8x128xf32, #tpu.memory_space<vmem>>, vector<1x8x128xf32>
    %34 = vector.shape_cast %33 : vector<1x8x128xf32> to vector<8x128xf32>
    %35 = vector.shape_cast %32 : vector<8x128xf32> to vector<1x8x128xf32>
    tpu.vector_store %arg4[%c0_11, %c0_12, %c0_13], %35 {strides = array<i32>} : memref<1x8x128xf32, #tpu.memory_space<vmem>>, vector<1x8x128xf32>,
    return
  }
  func.func @transform_0(%arg0: i32) -> (i32, i32) {
    %c0_i32 = arith.constant 0 : i32
    %c0_i32_0 = arith.constant 0 : i32
    %c0_i32_1 = arith.constant 0 : i32
    return %c0_i32, %c0_i32_0 : i32, i32
  }
  func.func @transform_1(%arg0: i32) -> (i32, i32) {
    %c0_i32 = arith.constant 0 : i32
    %c0_i32_0 = arith.constant 0 : i32
    return %arg0, %c0_i32 : i32, i32
  }
  func.func @transform_2(%arg0: i32) -> (i32, i32) {
    %c0_i32 = arith.constant 0 : i32
    %c0_i32_0 = arith.constant 0 : i32
    return %arg0, %c0_i32 : i32, i32
  }
  func.func @transform_3(%arg0: i32) -> (i32, i32, i32) {
    %c0_i32 = arith.constant 0 : i32
    %c0_i32_0 = arith.constant 0 : i32
    %c0_i32_1 = arith.constant 0 : i32
    return %arg0, %c0_i32, %c0_i32_0 : i32, i32, i32
  }
}

module attributes {stable_mosaic.version = 11 : i64} {
  func.func @_silog_kernel(%arg0: i32, %arg1: memref<128x512xf32, #tpu.memory_space<vmem>>, %arg2: memref<8x128xf32, #tpu.memory_space<vmem>>, %arg3: memref<8x512xf32, #tpu.memory_space<vmem>>, %arg4: memref<1x8x128xf32, #tpu.memory_space<vmem>>) attributes {dimension_semantics = [#tpu.dimension_semantics<parallel>], iteration_bounds = array<i64: 1>, scalar_prefetch = 0 : i64, scratch_operands = 0 : i64, tpu.core_type = #tpu.core_type<tc>, window_params = [{pipeline_mode = #tpu.pipeline_mode<synchronous>, transform_indices = @transform_0, window_bounds = array<i64: 128, 512>}, {transform_indices = @transform_1, window_bounds = array<i64: 8, 128>}, {transform_indices = @transform_2, window_bounds = array<i64: 8, 512>}, {transform_indices = @transform_3, window_bounds = array<i64: 1, 8, 128>}]} {
    %c0 = arith.constant 0 : index
    %c0_0 = arith.constant 0 : index
    %0 = vector.load %arg2[%c0, %c0_0] : memref<8x128xf32, #tpu.memory_space<vmem>>, vector<8x128xf32>
    %c0_1 = arith.constant 0 : index
    %c0_2 = arith.constant 0 : index
    %1 = vector.load %arg1[%c0_1, %c0_2] : memref<128x512xf32, #tpu.memory_space<vmem>>, vector<128x512xf32>
    %cst = arith.constant dense<0.000000e+00> : vector<8x512xf32>
    %2 = tpu.matmul %0, %1, %cst {dimension_numbers = #tpu.dot_dimension_numbers<[1], [0], [0], [1], [0, 0, 1, 1], [], []>} : vector<8x128xf32>, vector<128x512xf32>, vector<8x512xf32> -> vector<8x512xf32>
    %c0_3 = arith.constant 0 : index
    %c0_4 = arith.constant 0 : index
    %3 = vector.load %arg3[%c0_3, %c0_4] : memref<8x512xf32, #tpu.memory_space<vmem>>, vector<8x512xf32>
    %4 = arith.divf %2, %3 : vector<8x512xf32>
    %5 = math.log %4 : vector<8x512xf32>
    %6 = vector.shape_cast %5 : vector<8x512xf32> to vector<1x8x512xf32>
    %cst_5 = arith.constant dense<0.000000e+00> : vector<1xf32>
    %7 = vector.multi_reduction <add>, %6, %cst_5 [1, 2] : vector<1x8x512xf32> to vector<1xf32>
    %8 = vector.shape_cast %7 : vector<1xf32> to vector<1x1x1xf32>
    %9 = vector.extract %8[0, 0, 0] : f32 from vector<1x1x1xf32>
    %cst_6 = arith.constant 4.096000e+03 : f32
    %cst_7 = arith.constant 1.000000e+00 : f32
    %10 = arith.maximumf %cst_6, %cst_7 : f32
    %11 = arith.divf %9, %10 : f32
    %12 = vector.broadcast %11 : f32 to vector<8x512xf32>
    %13 = arith.subf %5, %12 : vector<8x512xf32>
    %14 = arith.mulf %13, %13 : vector<8x512xf32>
    %15 = vector.shape_cast %14 : vector<8x512xf32> to vector<1x8x512xf32>
    %cst_8 = arith.constant dense<0.000000e+00> : vector<1xf32>
    %16 = vector.multi_reduction <add>, %15, %cst_8 [1, 2] : vector<1x8x512xf32> to vector<1xf32>
    %17 = vector.shape_cast %16 : vector<1xf32> to vector<1x1x1xf32>
    %18 = vector.extract %17[0, 0, 0] : f32 from vector<1x1x1xf32>
    %19 = tpu.iota {dimensions = array<i32: 0>} : vector<8x128xi32>
    %c0_i32 = arith.constant 0 : i32
    %20 = vector.broadcast %c0_i32 : i32 to vector<8x128xi32>
    %21 = arith.cmpi eq, %19, %20 : vector<8x128xi32>
    %c1_i32 = arith.constant 1 : i32
    %22 = vector.broadcast %c1_i32 : i32 to vector<8x128xi32>
    %23 = arith.cmpi eq, %19, %22 : vector<8x128xi32>
    %c2_i32 = arith.constant 2 : i32
    %24 = vector.broadcast %c2_i32 : i32 to vector<8x128xi32>
    %25 = arith.cmpi eq, %19, %24 : vector<8x128xi32>
    %cst_9 = arith.constant 4.096000e+03 : f32
    %cst_10 = arith.constant 0.000000e+00 : f32
    %26 = vector.broadcast %cst_9 : f32 to vector<8x128xf32>
    %27 = vector.broadcast %cst_10 : f32 to vector<8x128xf32>
    %28 = arith.select %25, %26, %27 : vector<8x128xi1>, vector<8x128xf32>
    %29 = vector.broadcast %18 : f32 to vector<8x128xf32>
    %30 = arith.select %23, %29, %28 : vector<8x128xi1>, vector<8x128xf32>
    %31 = vector.broadcast %9 : f32 to vector<8x128xf32>
    %32 = arith.select %21, %31, %30 : vector<8x128xi1>, vector<8x128xf32>
    %c0_11 = arith.constant 0 : index
    %c0_12 = arith.constant 0 : index
    %c0_13 = arith.constant 0 : index
    %33 = vector.load %arg4[%c0_11, %c0_12, %c0_13] : memref<1x8x128xf32, #tpu.memory_space<vmem>>, vector<1x8x128xf32>
    %34 = vector.shape_cast %33 : vector<1x8x128xf32> to vector<8x128xf32>
    %35 = vector.shape_cast %32 : vector<8x128xf32> to vector<1x8x128xf32>
    tpu.vector_store %arg4[%c0_11, %c0_12, %c0_13], %35 {strides = array<i32>} : memref<1x8x128xf32, #tpu.memory_space<vmem>>, vector<1x8x128xf32>,
    return
  }
  func.func @transform_0(%arg0: i32) -> (i32, i32) {
    %c0_i32 = arith.constant 0 : i32
    %c0_i32_0 = arith.constant 0 : i32
    %c0_i32_1 = arith.constant 0 : i32
    return %c0_i32, %c0_i32_0 : i32, i32
  }
  func.func @transform_1(%arg0: i32) -> (i32, i32) {
    %c0_i32 = arith.constant 0 : i32
    %c0_i32_0 = arith.constant 0 : i32
    return %arg0, %c0_i32 : i32, i32
  }
  func.func @transform_2(%arg0: i32) -> (i32, i32) {
    %c0_i32 = arith.constant 0 : i32
    %c0_i32_0 = arith.constant 0 : i32
    return %arg0, %c0_i32 : i32, i32
  }
  func.func @transform_3(%arg0: i32) -> (i32, i32, i32) {
    %c0_i32 = arith.constant 0 : i32
    %c0_i32_0 = arith.constant 0 : i32
    %c0_i32_1 = arith.constant 0 : i32
    return %arg0, %c0_i32, %c0_i32_0 : i32, i32, i32
  }
}

</mosaic_0001>

<bundles_post_ra>
// kernel: tpu_custom_call.1
= control target key start
LH: loop header
LB: loop body
LE: loop exit
PB: predicated region body
PF: predicated region fallthrough
CT: control target
= control target key end

     0   :  { %8 = vsyncpa [#allocation3], 0  ;;  %s501_s0 = inlined_call_operand.hbm [shape: f32[128,512], index: 0, kind: input, shape index: {}]   ;;  %s502_s1 = inlined_call_operand.hbm [shape: f32[8,128], index: 1, kind: input, shape index: {}]   ;;  %s503_s2 = inlined_call_operand.hbm [shape: f32[8,512], index: 2, kind: input, shape index: {}]   ;;  %s504_s3 = inlined_call_operand.hbm [shape: f32[1,8,128], index: 3, kind: output, shape index: {}]  }
   0x1   :  { %9 = vsyncpa [#allocation6], 0 }
   0x2   :  { %10 = vsyncpa [#allocation4], 0  ;;  %s455_s12 = smov [#allocation5]   ;;  %s456_s14 = smov [#allocation2]  }
   0x3   :  { %s29_s13 = sshll.u32 %s455_s12, 4  ;;  %s16_s15 = sshll.u32 %s456_s14, 4  ;;  %s30_s13 = int_to_ptr.vmem [resolvable:$true] %s29_s13  ;;  %s17_s15 = int_to_ptr.vmem [resolvable:$true] %s16_s15 }
   0x4   :  { %s377_s16 = scalar_lea.vmem %s30_s13, 128  ;;  %p382_p1 = scmp.lt.s32.totalorder %s30_s13, %s30_s13 }
   0x5   :  { %p378_p0 = scmp.ne.s32.totalorder %s30_s13, %s377_s16  ;;  %p383_p2 = scmp.lt.s32.totalorder %s377_s16, %s377_s16 }
   0x7   :  { %p384_p3 = por %p383_p2, %p382_p1 }
   0x9   :  { %p385_p4 = pnand %p384_p3, %p378_p0 }
   0xb   :  { %388 = shalt.err (!%p385_p4)
}
   0xc   :  { %32 = dma.hbm_to_vmem [thread:$0]  %s502_s1, 128, %s30_s13, [#allocation6]  }
   0xd   :  { %s397_s19 = scalar_lea.vmem %s17_s15, 8192  ;;  %p402_p6 = scmp.lt.s32.totalorder %s17_s15, %s17_s15 }
   0xe   :  { %p398_p5 = scmp.ne.s32.totalorder %s17_s15, %s397_s19  ;;  %p403_p7 = scmp.lt.s32.totalorder %s397_s19, %s397_s19 }
  0x10   :  { %p404_p8 = por %p403_p7, %p402_p6 }
  0x12   :  { %p405_p9 = pnand %p404_p8, %p398_p5 }
  0x14   :  { %408 = shalt.err (!%p405_p9)
}
  0x15   :  { %s457_s20 = smov 512   ;;  %s458_s21 = smov 32  }
  0x16   :  { %22 = dma.hbm_to_vmem [thread:$0]  %s501_s0, 8192, %s17_s15, [#allocation3], %s457_s20, %s457_s20, %s458_s21  }
  0x17   :  { %s459_s24 = smov [#allocation7]  }
  0x18   :  { %s39_s25 = sshll.u32 %s459_s24, 4  ;;  %s40_s25 = int_to_ptr.vmem [resolvable:$true] %s39_s25 }
  0x19   :  { %s417_s26 = scalar_lea.vmem %s40_s25, 512  ;;  %p422_p11 = scmp.lt.s32.totalorder %s40_s25, %s40_s25 }
  0x1a   :  { %p418_p10 = scmp.ne.s32.totalorder %s40_s25, %s417_s26  ;;  %p423_p12 = scmp.lt.s32.totalorder %s417_s26, %s417_s26 }
  0x1c   :  { %p424_p13 = por %p423_p12, %p422_p11 }
  0x1e   :  { %p425_p0 = pnand %p424_p13, %p418_p10 }
  0x20   :  { %428 = shalt.err (!%p425_p0)
}
  0x21   :  { %42 = dma.hbm_to_vmem [thread:$0]  %s503_s2, 512, %s40_s25, [#allocation6]  }
  0x22   :  { %449 = dma.done.wait [#allocation3], 8192  }
  0x23   :  { %450 = vsyncadd [#allocation3], 4294959104 }
  0x24   :  { %451 = dma.done.wait [#allocation6], 640  }
  0x25   :  { %452 = vsyncadd [#allocation6], 4294966656  ;;  %v460_v0 = vmov 0.0   ;;  %v114_v1 = vld [vmem:[#allocation2 + $0x1e8] sm:$0xff]  ;;  %v113_v2 = vld [vmem:[#allocation2 + $0x1e0] sm:$0xff]  ;;  %s461_s28 = smov [#allocation8]  }
  0x26   :  { %181 = vmatprep.mubr.f32.mxu0 %v460_v0  ;;  %252 = vmatprep.mubr.f32.mxu1 %v460_v0  ;;  %v110_v3 = vld [vmem:[#allocation2 + $0x1c8] sm:$0xff]  ;;  %v116_v4 = vld [vmem:[#allocation2 + $0x1f8] sm:$0xff]  ;;  %v109_v5 = vld [vmem:[#allocation2 + $0x1c0] sm:$0xff]  ;;  %s332_s29 = sshll.u32 %s461_s28, 4  ;;  %s333_s29 = int_to_ptr.vmem [resolvable:$true] %s332_s29 }
  0x27   :  { %117 = vmatprep.subr.mxu0 %v114_v1  ;;  %v115_v6 = vld [vmem:[#allocation2 + $0x1f0] sm:$0xff]  ;;  %188 = vmatprep.subr.mxu1 %v116_v4  ;;  %v106_v7 = vld [vmem:[#allocation2 + $0x1a8] sm:$0xff]  ;;  %v112_v8 = vld [vmem:[#allocation2 + $0x1d8] sm:$0xff]  ;;  %s429_s4 = scalar_lea.vmem %s333_s29, 128  ;;  %p434_p2 = scmp.lt.s32.totalorder %s333_s29, %s333_s29 }
  0x28   :  { %118 = vmatpush1.msra.mxu0 %v113_v2  ;;  %189 = vmatpush1.msra.mxu1 %v115_v6  ;;  %v105_v9 = vld [vmem:[#allocation2 + $0x1a0] sm:$0xff]  ;;  %v111_v10 = vld [vmem:[#allocation2 + $0x1d0] sm:$0xff]  ;;  %v108_v11 = vld [vmem:[#allocation2 + $0x1b8] sm:$0xff]  ;;  %p430_p1 = scmp.ne.s32.totalorder %s333_s29, %s429_s4  ;;  %p435_p3 = scmp.lt.s32.totalorder %s429_s4, %s429_s4 }
  0x29   :  { %119 = vmatprep.subr.mxu0 %v110_v3  ;;  %190 = vmatprep.subr.mxu1 %v112_v8  ;;  %v102_v12 = vld [vmem:[#allocation2 + $0x188] sm:$0xff]  ;;  %v107_v13 = vld [vmem:[#allocation2 + $0x1b0] sm:$0xff]  ;;  %v101_v14 = vld [vmem:[#allocation2 + $0x180] sm:$0xff] }
  0x2a   :  { %120 = vmatpush1.msra.mxu0 %v109_v5  ;;  %191 = vmatpush1.msra.mxu1 %v111_v10  ;;  %v104_v15 = vld [vmem:[#allocation2 + $0x198] sm:$0xff]  ;;  %v98_v16 = vld [vmem:[#allocation2 + $0x168] sm:$0xff]  ;;  %v103_v17 = vld [vmem:[#allocation2 + $0x190] sm:$0xff]  ;;  %p436_p4 = por %p435_p3, %p434_p2 }
  0x2b   :  { %121 = vmatprep.subr.mxu0 %v106_v7  ;;  %192 = vmatprep.subr.mxu1 %v108_v11  ;;  %v97_v18 = vld [vmem:[#allocation2 + $0x160] sm:$0xff]  ;;  %v100_v19 = vld [vmem:[#allocation2 + $0x178] sm:$0xff]  ;;  %v94_v20 = vld [vmem:[#allocation2 + $0x148] sm:$0xff] }
  0x2c   :  { %122 = vmatpush1.msra.mxu0 %v105_v9  ;;  %193 = vmatpush1.msra.mxu1 %v107_v13  ;;  %v99_v21 = vld [vmem:[#allocation2 + $0x170] sm:$0xff]  ;;  %v93_v22 = vld [vmem:[#allocation2 + $0x140] sm:$0xff]  ;;  %v96_v23 = vld [vmem:[#allocation2 + $0x158] sm:$0xff]  ;;  %p437_p5 = pnand %p436_p4, %p430_p1 }
  0x2d   :  { %123 = vmatprep.subr.mxu0 %v102_v12  ;;  %194 = vmatprep.subr.mxu1 %v104_v15  ;;  %v90_v24 = vld [vmem:[#allocation2 + $0x128] sm:$0xff]  ;;  %v95_v25 = vld [vmem:[#allocation2 + $0x150] sm:$0xff]  ;;  %v89_v26 = vld [vmem:[#allocation2 + $0x120] sm:$0xff] }
  0x2e   :  { %124 = vmatpush1.msra.mxu0 %v101_v14  ;;  %195 = vmatpush1.msra.mxu1 %v103_v17  ;;  %v92_v27 = vld [vmem:[#allocation2 + $0x138] sm:$0xff]  ;;  %v86_v28 = vld [vmem:[#allocation2 + $0x108] sm:$0xff]  ;;  %v91_v29 = vld [vmem:[#allocation2 + $0x130] sm:$0xff] }
  0x2f   :  { %125 = vmatprep.subr.mxu0 %v98_v16  ;;  %196 = vmatprep.subr.mxu1 %v100_v19  ;;  %v85_v30 = vld [vmem:[#allocation2 + $0x100] sm:$0xff]  ;;  %v88_v31 = vld [vmem:[#allocation2 + $0x118] sm:$0xff]  ;;  %v82_v32 = vld [vmem:[#allocation2 + $0xe8] sm:$0xff] }
  0x30   :  { %126 = vmatpush1.msra.mxu0 %v97_v18  ;;  %197 = vmatpush1.msra.mxu1 %v99_v21  ;;  %v87_v33 = vld [vmem:[#allocation2 + $0x110] sm:$0xff]  ;;  %v81_v34 = vld [vmem:[#allocation2 + $0xe0] sm:$0xff]  ;;  %v84_v35 = vld [vmem:[#allocation2 + $0xf8] sm:$0xff] }
  0x31   :  { %127 = vmatprep.subr.mxu0 %v94_v20  ;;  %198 = vmatprep.subr.mxu1 %v96_v23  ;;  %v78_v36 = vld [vmem:[#allocation2 + $0xc8] sm:$0xff]  ;;  %v83_v37 = vld [vmem:[#allocation2 + $0xf0] sm:$0xff]  ;;  %v77_v38 = vld [vmem:[#allocation2 + $0xc0] sm:$0xff] }
  0x32   :  { %128 = vmatpush1.msra.mxu0 %v93_v22  ;;  %199 = vmatpush1.msra.mxu1 %v95_v25  ;;  %v80_v39 = vld [vmem:[#allocation2 + $0xd8] sm:$0xff]  ;;  %v74_v40 = vld [vmem:[#allocation2 + $0xa8] sm:$0xff]  ;;  %v79_v41 = vld [vmem:[#allocation2 + $0xd0] sm:$0xff] }
  0x33   :  { %129 = vmatprep.subr.mxu0 %v90_v24  ;;  %200 = vmatprep.subr.mxu1 %v92_v27  ;;  %v73_v42 = vld [vmem:[#allocation2 + $0xa0] sm:$0xff]  ;;  %v76_v43 = vld [vmem:[#allocation2 + $0xb8] sm:$0xff]  ;;  %v70_v44 = vld [vmem:[#allocation2 + $0x88] sm:$0xff] }
  0x34   :  { %130 = vmatpush1.msra.mxu0 %v89_v26  ;;  %201 = vmatpush1.msra.mxu1 %v91_v29  ;;  %v75_v45 = vld [vmem:[#allocation2 + $0xb0] sm:$0xff]  ;;  %v69_v46 = vld [vmem:[#allocation2 + $0x80] sm:$0xff]  ;;  %v72_v47 = vld [vmem:[#allocation2 + $0x98] sm:$0xff] }
  0x35   :  { %131 = vmatprep.subr.mxu0 %v86_v28  ;;  %202 = vmatprep.subr.mxu1 %v88_v31  ;;  %v66_v48 = vld [vmem:[#allocation2 + $0x68] sm:$0xff]  ;;  %v71_v49 = vld [vmem:[#allocation2 + $0x90] sm:$0xff]  ;;  %v65_v50 = vld [vmem:[#allocation2 + $0x60] sm:$0xff] }
  0x36   :  { %132 = vmatpush1.msra.mxu0 %v85_v30  ;;  %203 = vmatpush1.msra.mxu1 %v87_v33  ;;  %v68_v51 = vld [vmem:[#allocation2 + $0x78] sm:$0xff]  ;;  %v62_v52 = vld [vmem:[#allocation2 + $0x48] sm:$0xff]  ;;  %v67_v53 = vld [vmem:[#allocation2 + $0x70] sm:$0xff] }
  0x37   :  { %133 = vmatprep.subr.mxu0 %v82_v32  ;;  %204 = vmatprep.subr.mxu1 %v84_v35  ;;  %v61_v54 = vld [vmem:[#allocation2 + $0x40] sm:$0xff]  ;;  %v64_v55 = vld [vmem:[#allocation2 + $0x58] sm:$0xff]  ;;  %v58_v56 = vld [vmem:[#allocation2 + $0x28] sm:$0xff] }
  0x38   :  { %134 = vmatpush1.msra.mxu0 %v81_v34  ;;  %205 = vmatpush1.msra.mxu1 %v83_v37  ;;  %v63_v57 = vld [vmem:[#allocation2 + $0x50] sm:$0xff]  ;;  %v57_v58 = vld [vmem:[#allocation2 + $0x20] sm:$0xff]  ;;  %v60_v59 = vld [vmem:[#allocation2 + $0x38] sm:$0xff] }
  0x39   :  { %135 = vmatprep.subr.mxu0 %v78_v36  ;;  %206 = vmatprep.subr.mxu1 %v80_v39  ;;  %v54_v60 = vld [vmem:[#allocation2 + $0x8] sm:$0xff]  ;;  %v59_v61 = vld [vmem:[#allocation2 + $0x30] sm:$0xff]  ;;  %v53_v62 = vld [vmem:[#allocation2] sm:$0xff] }
  0x3a   :  { %136 = vmatpush1.msra.mxu0 %v77_v38  ;;  %207 = vmatpush1.msra.mxu1 %v79_v41  ;;  %v56_v63 = vld [vmem:[#allocation2 + $0x18] sm:$0xff]  ;;  %v52_v1 = vld [vmem:[#allocation5] sm:$0xff]  ;;  %v55_v2 = vld [vmem:[#allocation2 + $0x10] sm:$0xff] }
  0x3b   :  { %137 = vmatprep.subr.mxu0 %v74_v40  ;;  %208 = vmatprep.subr.mxu1 %v76_v43  ;;  %v259_v3 = vld [vmem:[#allocation7] sm:$0xff]  ;;  %v261_v4 = vld [vmem:[#allocation7 + $0x10] sm:$0xff]  ;;  %v260_v5 = vld [vmem:[#allocation7 + $0x8] sm:$0xff] }
  0x3c   :  { %138 = vmatpush1.msra.mxu0 %v73_v42  ;;  %209 = vmatpush1.msra.mxu1 %v75_v45  ;;  %353 = vrcp.f32 %v259_v3  ;;  %v262_v6 = vld [vmem:[#allocation7 + $0x18] sm:$0xff] }
  0x3d   :  { %139 = vmatprep.subr.mxu0 %v70_v44  ;;  %210 = vmatprep.subr.mxu1 %v72_v47  ;;  %355 = vrcp.f32 %v261_v4 }
  0x3e   :  { %140 = vmatpush1.msra.mxu0 %v69_v46  ;;  %211 = vmatpush1.msra.mxu1 %v71_v49  ;;  %357 = vrcp.f32 %v260_v5 }
  0x3f   :  { %141 = vmatprep.subr.mxu0 %v66_v48  ;;  %212 = vmatprep.subr.mxu1 %v68_v51  ;;  %359 = vrcp.f32 %v262_v6 }
  0x40   :  { %142 = vmatpush1.msra.mxu0 %v65_v50  ;;  %213 = vmatpush1.msra.mxu1 %v67_v53 }
  0x41   :  { %143 = vmatprep.subr.mxu0 %v62_v52  ;;  %214 = vmatprep.subr.mxu1 %v64_v55 }
  0x42   :  { %144 = vmatpush1.msra.mxu0 %v61_v54  ;;  %215 = vmatpush1.msra.mxu1 %v63_v57 }
  0x43   :  { %145 = vmatprep.subr.mxu0 %v58_v56  ;;  %216 = vmatprep.subr.mxu1 %v60_v59  ;;  %v315_v56 = vlaneseq }
  0x44   :  { %146 = vmatpush1.msra.mxu0 %v57_v58  ;;  %217 = vmatpush1.msra.mxu1 %v59_v61 }
  0x45   :  { %147 = vmatprep.subr.mxu0 %v54_v60  ;;  %218 = vmatprep.subr.mxu1 %v56_v63  ;;  %v316_v57 = vshrl.u32 %v315_v56, 7 }
  0x46   :  { %148 = vmatpush1.msra.mxu0 %v53_v62  ;;  %219 = vmatpush1.msra.mxu1 %v55_v2 }
  0x47   :  { %182 = vmatmul.mubr.f32.vlgmr.msra.gmra.mxu0 %v52_v1  ;;  %253 = vmatmul.mubr.f32.vlgmr.msra.gmra.mxu1 %v52_v1  ;;  %vm319_vm0 = vcmp.eq.s32.totalorder %v316_v57, 2  ;;  %vm318_vm1 = vcmp.eq.s32.totalorder %v316_v57, 1  ;;  %vm317_vm2 = vcmp.eq.s32.totalorder %v316_v57, 0 }
  0x48   :  { %v320_v58 = vsel %vm319_vm0, 4096.0, %v460_v0 }
  0x49   :  { %v354_v7 = vpop.eup %353 }
  0x4a   :  { %v356_v8 = vpop.eup %355 }
  0x4b   :  { %v358_v9 = vpop.eup %357 }
  0x4c   :  { %v360_v11 = vpop.eup %359 }
 0x107   :  { %v183_v10 = vpop.f32.mrf.mxu0  ;;  %v254_v13 = vpop.f32.mrf.mxu1 }
 0x108   :  { %v264_v12 = vmul.f32 %v354_v7, %v183_v10  ;;  %v268_v15 = vmul.f32 %v356_v8, %v254_v13 }
 0x109   :  { %v185_v14 = vpop.f32.mrf.mxu0  ;;  %v256_v17 = vpop.f32.mrf.mxu1 }
 0x10a   :  { %361 = vlog2.f32 %v264_v12  ;;  %v266_v16 = vmul.f32 %v358_v9, %v185_v14  ;;  %v270_v18 = vmul.f32 %v360_v11, %v256_v17 }
 0x10b   :  { %363 = vlog2.f32 %v268_v15 }
 0x10c   :  { %365 = vlog2.f32 %v266_v16 }
 0x10d   :  { %367 = vlog2.f32 %v270_v18 }
 0x117   :  { %v362_v19 = vpop.eup %361 }
 0x118   :  { %v364_v20 = vpop.eup %363  ;;  %v272_v22 = vmul.f32 0.6931472, %v362_v19 }
 0x119   :  { %v366_v21 = vpop.eup %365  ;;  %v276_v24 = vmul.f32 0.6931472, %v364_v20 }
 0x11a   :  { %v274_v23 = vmul.f32 0.6931472, %v366_v21  ;;  %v368_v25 = vpop.eup %367 }
 0x11b   :  { %v278_v27 = vmul.f32 0.6931472, %v368_v25 }
 0x11c   :  { %v279_v26 = vadd.f32 %v274_v23, %v272_v22 }
 0x11e   :  { %v280_v28 = vadd.f32 %v279_v26, %v276_v24 }
 0x120   :  { %v281_v29 = vadd.f32 %v280_v28, %v278_v27 }
 0x122   :  { %282 = vadd.xlane.f32.xlu0 %v281_v29 }
 0x1ab   :  { %v283_v30 = vpop.xlane.xlu0 %282 }
 0x1ac   :  { %v284_v31 = vrot.slane %v283_v30, 4 }
 0x1ae   :  { %v285_v32 = vadd.f32 %v284_v31, %v283_v30 }
 0x1b0   :  { %v286_v33 = vrot.slane %v285_v32, 2 }
 0x1b2   :  { %v287_v34 = vadd.f32 %v286_v33, %v285_v32 }
 0x1b4   :  { %v288_v35 = vrot.slane %v287_v34, 1 }
 0x1b6   :  { %v289_v36 = vadd.f32 %v288_v35, %v287_v34 }
 0x1b8   :  { %342 = vpush %v289_v36 }
 0x1e9   :  { %s493_s0 = spop %342 }
 0x1ea   :  { %s293_s2 = smul.f32 0.00024414063, %s493_s0  ;;  %v323_v60 = vstv %s493_s0 }
 0x1ec   :  { %v294_v37 = vstv %s293_s2 }
 0x1ed   :  { %v295_v38 = vsub.f32 %v272_v22, %v294_v37  ;;  %v296_v39 = vsub.f32 %v274_v23, %v294_v37  ;;  %v297_v40 = vsub.f32 %v276_v24, %v294_v37  ;;  %v298_v43 = vsub.f32 %v278_v27, %v294_v37 }
 0x1ef   :  { %v299_v41 = vmul.f32 %v295_v38, %v295_v38  ;;  %v300_v42 = vmul.f32 %v296_v39, %v296_v39  ;;  %v301_v44 = vmul.f32 %v297_v40, %v297_v40  ;;  %v302_v46 = vmul.f32 %v298_v43, %v298_v43 }
 0x1f1   :  { %v303_v45 = vadd.f32 %v300_v42, %v299_v41 }
 0x1f3   :  { %v304_v47 = vadd.f32 %v303_v45, %v301_v44 }
 0x1f5   :  { %v305_v48 = vadd.f32 %v304_v47, %v302_v46 }
 0x1f7   :  { %306 = vadd.xlane.f32.xlu0 %v305_v48 }
 0x280   :  { %v307_v49 = vpop.xlane.xlu0 %306 }
 0x281   :  { %v308_v50 = vrot.slane %v307_v49, 4 }
 0x283   :  { %v309_v51 = vadd.f32 %v308_v50, %v307_v49 }
 0x285   :  { %v310_v52 = vrot.slane %v309_v51, 2 }
 0x287   :  { %v311_v53 = vadd.f32 %v310_v52, %v309_v51 }
 0x289   :  { %v312_v54 = vrot.slane %v311_v53, 1 }
 0x28b   :  { %v313_v55 = vadd.f32 %v312_v54, %v311_v53 }
 0x28d   :  { %344 = vpush %v313_v55 }
 0x2be   :  { %s345_s30 = spop %344 }
 0x2bf   :  { %v321_v59 = vstv %s345_s30 }
 0x2c0   :  { %v322_v61 = vsel %vm318_vm1, %v321_v59, %v320_v58 }
 0x2c1   :  { %v324_v62 = vsel %vm317_vm2, %v323_v60, %v322_v61 }
 0x2c2   :  { %325 = vst [vmem:[#allocation8] sm:$0xff] %v324_v62 }
 0x2c3   :  { %440 = shalt.err (!%p437_p5)
}
 0x2c4   :  { %335 = dma.vmem_to_hbm [thread:$0]  %s333_s29, 128, %s504_s3, [#allocation4]  }
 0x2c5   :  { %453 = dma.done.wait [#allocation4], 128  }
 0x2c6   :  { %454 = vsyncadd [#allocation4], 4294967168 }
 0x2c7   :  { %339 = vsyncpa [#allocation3], 1 }
 0x2c8   :  { %340 = vsyncpa [#allocation6], 1 }
 0x2c9   :  { %341 = vsyncpa [#allocation4], 1 }

// kernel: tpu_custom_call.1
= control target key start
LH: loop header
LB: loop body
LE: loop exit
PB: predicated region body
PF: predicated region fallthrough
CT: control target
= control target key end

     0   :  { %8 = vsyncpa [#allocation3], 0  ;;  %s501_s0 = inlined_call_operand.hbm [shape: f32[128,512], index: 0, kind: input, shape index: {}]   ;;  %s502_s1 = inlined_call_operand.hbm [shape: f32[8,128], index: 1, kind: input, shape index: {}]   ;;  %s503_s2 = inlined_call_operand.hbm [shape: f32[8,512], index: 2, kind: input, shape index: {}]   ;;  %s504_s3 = inlined_call_operand.hbm [shape: f32[1,8,128], index: 3, kind: output, shape index: {}]  }
   0x1   :  { %9 = vsyncpa [#allocation6], 0 }
   0x2   :  { %10 = vsyncpa [#allocation4], 0  ;;  %s455_s12 = smov [#allocation5]   ;;  %s456_s14 = smov [#allocation2]  }
   0x3   :  { %s29_s13 = sshll.u32 %s455_s12, 4  ;;  %s16_s15 = sshll.u32 %s456_s14, 4  ;;  %s30_s13 = int_to_ptr.vmem [resolvable:$true] %s29_s13  ;;  %s17_s15 = int_to_ptr.vmem [resolvable:$true] %s16_s15 }
   0x4   :  { %s377_s16 = scalar_lea.vmem %s30_s13, 128  ;;  %p382_p1 = scmp.lt.s32.totalorder %s30_s13, %s30_s13 }
   0x5   :  { %p378_p0 = scmp.ne.s32.totalorder %s30_s13, %s377_s16  ;;  %p383_p2 = scmp.lt.s32.totalorder %s377_s16, %s377_s16 }
   0x7   :  { %p384_p3 = por %p383_p2, %p382_p1 }
   0x9   :  { %p385_p4 = pnand %p384_p3, %p378_p0 }
   0xb   :  { %388 = shalt.err (!%p385_p4)
}
   0xc   :  { %32 = dma.hbm_to_vmem [thread:$0]  %s502_s1, 128, %s30_s13, [#allocation6]  }
   0xd   :  { %s397_s19 = scalar_lea.vmem %s17_s15, 8192  ;;  %p402_p6 = scmp.lt.s32.totalorder %s17_s15, %s17_s15 }
   0xe   :  { %p398_p5 = scmp.ne.s32.totalorder %s17_s15, %s397_s19  ;;  %p403_p7 = scmp.lt.s32.totalorder %s397_s19, %s397_s19 }
  0x10   :  { %p404_p8 = por %p403_p7, %p402_p6 }
  0x12   :  { %p405_p9 = pnand %p404_p8, %p398_p5 }
  0x14   :  { %408 = shalt.err (!%p405_p9)
}
  0x15   :  { %s457_s20 = smov 512   ;;  %s458_s21 = smov 32  }
  0x16   :  { %22 = dma.hbm_to_vmem [thread:$0]  %s501_s0, 8192, %s17_s15, [#allocation3], %s457_s20, %s457_s20, %s458_s21  }
  0x17   :  { %s459_s24 = smov [#allocation7]  }
  0x18   :  { %s39_s25 = sshll.u32 %s459_s24, 4  ;;  %s40_s25 = int_to_ptr.vmem [resolvable:$true] %s39_s25 }
  0x19   :  { %s417_s26 = scalar_lea.vmem %s40_s25, 512  ;;  %p422_p11 = scmp.lt.s32.totalorder %s40_s25, %s40_s25 }
  0x1a   :  { %p418_p10 = scmp.ne.s32.totalorder %s40_s25, %s417_s26  ;;  %p423_p12 = scmp.lt.s32.totalorder %s417_s26, %s417_s26 }
  0x1c   :  { %p424_p13 = por %p423_p12, %p422_p11 }
  0x1e   :  { %p425_p0 = pnand %p424_p13, %p418_p10 }
  0x20   :  { %428 = shalt.err (!%p425_p0)
}
  0x21   :  { %42 = dma.hbm_to_vmem [thread:$0]  %s503_s2, 512, %s40_s25, [#allocation6]  }
  0x22   :  { %449 = dma.done.wait [#allocation3], 8192  }
  0x23   :  { %450 = vsyncadd [#allocation3], 4294959104 }
  0x24   :  { %451 = dma.done.wait [#allocation6], 640  }
  0x25   :  { %452 = vsyncadd [#allocation6], 4294966656  ;;  %v460_v0 = vmov 0.0   ;;  %v114_v1 = vld [vmem:[#allocation2 + $0x1e8] sm:$0xff]  ;;  %v113_v2 = vld [vmem:[#allocation2 + $0x1e0] sm:$0xff]  ;;  %s461_s28 = smov [#allocation8]  }
  0x26   :  { %181 = vmatprep.mubr.f32.mxu0 %v460_v0  ;;  %252 = vmatprep.mubr.f32.mxu1 %v460_v0  ;;  %v110_v3 = vld [vmem:[#allocation2 + $0x1c8] sm:$0xff]  ;;  %v116_v4 = vld [vmem:[#allocation2 + $0x1f8] sm:$0xff]  ;;  %v109_v5 = vld [vmem:[#allocation2 + $0x1c0] sm:$0xff]  ;;  %s332_s29 = sshll.u32 %s461_s28, 4  ;;  %s333_s29 = int_to_ptr.vmem [resolvable:$true] %s332_s29 }
  0x27   :  { %117 = vmatprep.subr.mxu0 %v114_v1  ;;  %v115_v6 = vld [vmem:[#allocation2 + $0x1f0] sm:$0xff]  ;;  %188 = vmatprep.subr.mxu1 %v116_v4  ;;  %v106_v7 = vld [vmem:[#allocation2 + $0x1a8] sm:$0xff]  ;;  %v112_v8 = vld [vmem:[#allocation2 + $0x1d8] sm:$0xff]  ;;  %s429_s4 = scalar_lea.vmem %s333_s29, 128  ;;  %p434_p2 = scmp.lt.s32.totalorder %s333_s29, %s333_s29 }
  0x28   :  { %118 = vmatpush1.msra.mxu0 %v113_v2  ;;  %189 = vmatpush1.msra.mxu1 %v115_v6  ;;  %v105_v9 = vld [vmem:[#allocation2 + $0x1a0] sm:$0xff]  ;;  %v111_v10 = vld [vmem:[#allocation2 + $0x1d0] sm:$0xff]  ;;  %v108_v11 = vld [vmem:[#allocation2 + $0x1b8] sm:$0xff]  ;;  %p430_p1 = scmp.ne.s32.totalorder %s333_s29, %s429_s4  ;;  %p435_p3 = scmp.lt.s32.totalorder %s429_s4, %s429_s4 }
  0x29   :  { %119 = vmatprep.subr.mxu0 %v110_v3  ;;  %190 = vmatprep.subr.mxu1 %v112_v8  ;;  %v102_v12 = vld [vmem:[#allocation2 + $0x188] sm:$0xff]  ;;  %v107_v13 = vld [vmem:[#allocation2 + $0x1b0] sm:$0xff]  ;;  %v101_v14 = vld [vmem:[#allocation2 + $0x180] sm:$0xff] }
  0x2a   :  { %120 = vmatpush1.msra.mxu0 %v109_v5  ;;  %191 = vmatpush1.msra.mxu1 %v111_v10  ;;  %v104_v15 = vld [vmem:[#allocation2 + $0x198] sm:$0xff]  ;;  %v98_v16 = vld [vmem:[#allocation2 + $0x168] sm:$0xff]  ;;  %v103_v17 = vld [vmem:[#allocation2 + $0x190] sm:$0xff]  ;;  %p436_p4 = por %p435_p3, %p434_p2 }
  0x2b   :  { %121 = vmatprep.subr.mxu0 %v106_v7  ;;  %192 = vmatprep.subr.mxu1 %v108_v11  ;;  %v97_v18 = vld [vmem:[#allocation2 + $0x160] sm:$0xff]  ;;  %v100_v19 = vld [vmem:[#allocation2 + $0x178] sm:$0xff]  ;;  %v94_v20 = vld [vmem:[#allocation2 + $0x148] sm:$0xff] }
  0x2c   :  { %122 = vmatpush1.msra.mxu0 %v105_v9  ;;  %193 = vmatpush1.msra.mxu1 %v107_v13  ;;  %v99_v21 = vld [vmem:[#allocation2 + $0x170] sm:$0xff]  ;;  %v93_v22 = vld [vmem:[#allocation2 + $0x140] sm:$0xff]  ;;  %v96_v23 = vld [vmem:[#allocation2 + $0x158] sm:$0xff]  ;;  %p437_p5 = pnand %p436_p4, %p430_p1 }
  0x2d   :  { %123 = vmatprep.subr.mxu0 %v102_v12  ;;  %194 = vmatprep.subr.mxu1 %v104_v15  ;;  %v90_v24 = vld [vmem:[#allocation2 + $0x128] sm:$0xff]  ;;  %v95_v25 = vld [vmem:[#allocation2 + $0x150] sm:$0xff]  ;;  %v89_v26 = vld [vmem:[#allocation2 + $0x120] sm:$0xff] }
  0x2e   :  { %124 = vmatpush1.msra.mxu0 %v101_v14  ;;  %195 = vmatpush1.msra.mxu1 %v103_v17  ;;  %v92_v27 = vld [vmem:[#allocation2 + $0x138] sm:$0xff]  ;;  %v86_v28 = vld [vmem:[#allocation2 + $0x108] sm:$0xff]  ;;  %v91_v29 = vld [vmem:[#allocation2 + $0x130] sm:$0xff] }
  0x2f   :  { %125 = vmatprep.subr.mxu0 %v98_v16  ;;  %196 = vmatprep.subr.mxu1 %v100_v19  ;;  %v85_v30 = vld [vmem:[#allocation2 + $0x100] sm:$0xff]  ;;  %v88_v31 = vld [vmem:[#allocation2 + $0x118] sm:$0xff]  ;;  %v82_v32 = vld [vmem:[#allocation2 + $0xe8] sm:$0xff] }
  0x30   :  { %126 = vmatpush1.msra.mxu0 %v97_v18  ;;  %197 = vmatpush1.msra.mxu1 %v99_v21  ;;  %v87_v33 = vld [vmem:[#allocation2 + $0x110] sm:$0xff]  ;;  %v81_v34 = vld [vmem:[#allocation2 + $0xe0] sm:$0xff]  ;;  %v84_v35 = vld [vmem:[#allocation2 + $0xf8] sm:$0xff] }
  0x31   :  { %127 = vmatprep.subr.mxu0 %v94_v20  ;;  %198 = vmatprep.subr.mxu1 %v96_v23  ;;  %v78_v36 = vld [vmem:[#allocation2 + $0xc8] sm:$0xff]  ;;  %v83_v37 = vld [vmem:[#allocation2 + $0xf0] sm:$0xff]  ;;  %v77_v38 = vld [vmem:[#allocation2 + $0xc0] sm:$0xff] }
  0x32   :  { %128 = vmatpush1.msra.mxu0 %v93_v22  ;;  %199 = vmatpush1.msra.mxu1 %v95_v25  ;;  %v80_v39 = vld [vmem:[#allocation2 + $0xd8] sm:$0xff]  ;;  %v74_v40 = vld [vmem:[#allocation2 + $0xa8] sm:$0xff]  ;;  %v79_v41 = vld [vmem:[#allocation2 + $0xd0] sm:$0xff] }
  0x33   :  { %129 = vmatprep.subr.mxu0 %v90_v24  ;;  %200 = vmatprep.subr.mxu1 %v92_v27  ;;  %v73_v42 = vld [vmem:[#allocation2 + $0xa0] sm:$0xff]  ;;  %v76_v43 = vld [vmem:[#allocation2 + $0xb8] sm:$0xff]  ;;  %v70_v44 = vld [vmem:[#allocation2 + $0x88] sm:$0xff] }
  0x34   :  { %130 = vmatpush1.msra.mxu0 %v89_v26  ;;  %201 = vmatpush1.msra.mxu1 %v91_v29  ;;  %v75_v45 = vld [vmem:[#allocation2 + $0xb0] sm:$0xff]  ;;  %v69_v46 = vld [vmem:[#allocation2 + $0x80] sm:$0xff]  ;;  %v72_v47 = vld [vmem:[#allocation2 + $0x98] sm:$0xff] }
  0x35   :  { %131 = vmatprep.subr.mxu0 %v86_v28  ;;  %202 = vmatprep.subr.mxu1 %v88_v31  ;;  %v66_v48 = vld [vmem:[#allocation2 + $0x68] sm:$0xff]  ;;  %v71_v49 = vld [vmem:[#allocation2 + $0x90] sm:$0xff]  ;;  %v65_v50 = vld [vmem:[#allocation2 + $0x60] sm:$0xff] }
  0x36   :  { %132 = vmatpush1.msra.mxu0 %v85_v30  ;;  %203 = vmatpush1.msra.mxu1 %v87_v33  ;;  %v68_v51 = vld [vmem:[#allocation2 + $0x78] sm:$0xff]  ;;  %v62_v52 = vld [vmem:[#allocation2 + $0x48] sm:$0xff]  ;;  %v67_v53 = vld [vmem:[#allocation2 + $0x70] sm:$0xff] }
  0x37   :  { %133 = vmatprep.subr.mxu0 %v82_v32  ;;  %204 = vmatprep.subr.mxu1 %v84_v35  ;;  %v61_v54 = vld [vmem:[#allocation2 + $0x40] sm:$0xff]  ;;  %v64_v55 = vld [vmem:[#allocation2 + $0x58] sm:$0xff]  ;;  %v58_v56 = vld [vmem:[#allocation2 + $0x28] sm:$0xff] }
  0x38   :  { %134 = vmatpush1.msra.mxu0 %v81_v34  ;;  %205 = vmatpush1.msra.mxu1 %v83_v37  ;;  %v63_v57 = vld [vmem:[#allocation2 + $0x50] sm:$0xff]  ;;  %v57_v58 = vld [vmem:[#allocation2 + $0x20] sm:$0xff]  ;;  %v60_v59 = vld [vmem:[#allocation2 + $0x38] sm:$0xff] }
  0x39   :  { %135 = vmatprep.subr.mxu0 %v78_v36  ;;  %206 = vmatprep.subr.mxu1 %v80_v39  ;;  %v54_v60 = vld [vmem:[#allocation2 + $0x8] sm:$0xff]  ;;  %v59_v61 = vld [vmem:[#allocation2 + $0x30] sm:$0xff]  ;;  %v53_v62 = vld [vmem:[#allocation2] sm:$0xff] }
  0x3a   :  { %136 = vmatpush1.msra.mxu0 %v77_v38  ;;  %207 = vmatpush1.msra.mxu1 %v79_v41  ;;  %v56_v63 = vld [vmem:[#allocation2 + $0x18] sm:$0xff]  ;;  %v52_v1 = vld [vmem:[#allocation5] sm:$0xff]  ;;  %v55_v2 = vld [vmem:[#allocation2 + $0x10] sm:$0xff] }
  0x3b   :  { %137 = vmatprep.subr.mxu0 %v74_v40  ;;  %208 = vmatprep.subr.mxu1 %v76_v43  ;;  %v259_v3 = vld [vmem:[#allocation7] sm:$0xff]  ;;  %v261_v4 = vld [vmem:[#allocation7 + $0x10] sm:$0xff]  ;;  %v260_v5 = vld [vmem:[#allocation7 + $0x8] sm:$0xff] }
  0x3c   :  { %138 = vmatpush1.msra.mxu0 %v73_v42  ;;  %209 = vmatpush1.msra.mxu1 %v75_v45  ;;  %353 = vrcp.f32 %v259_v3  ;;  %v262_v6 = vld [vmem:[#allocation7 + $0x18] sm:$0xff] }
  0x3d   :  { %139 = vmatprep.subr.mxu0 %v70_v44  ;;  %210 = vmatprep.subr.mxu1 %v72_v47  ;;  %355 = vrcp.f32 %v261_v4 }
  0x3e   :  { %140 = vmatpush1.msra.mxu0 %v69_v46  ;;  %211 = vmatpush1.msra.mxu1 %v71_v49  ;;  %357 = vrcp.f32 %v260_v5 }
  0x3f   :  { %141 = vmatprep.subr.mxu0 %v66_v48  ;;  %212 = vmatprep.subr.mxu1 %v68_v51  ;;  %359 = vrcp.f32 %v262_v6 }
  0x40   :  { %142 = vmatpush1.msra.mxu0 %v65_v50  ;;  %213 = vmatpush1.msra.mxu1 %v67_v53 }
  0x41   :  { %143 = vmatprep.subr.mxu0 %v62_v52  ;;  %214 = vmatprep.subr.mxu1 %v64_v55 }
  0x42   :  { %144 = vmatpush1.msra.mxu0 %v61_v54  ;;  %215 = vmatpush1.msra.mxu1 %v63_v57 }
  0x43   :  { %145 = vmatprep.subr.mxu0 %v58_v56  ;;  %216 = vmatprep.subr.mxu1 %v60_v59  ;;  %v315_v56 = vlaneseq }
  0x44   :  { %146 = vmatpush1.msra.mxu0 %v57_v58  ;;  %217 = vmatpush1.msra.mxu1 %v59_v61 }
  0x45   :  { %147 = vmatprep.subr.mxu0 %v54_v60  ;;  %218 = vmatprep.subr.mxu1 %v56_v63  ;;  %v316_v57 = vshrl.u32 %v315_v56, 7 }
  0x46   :  { %148 = vmatpush1.msra.mxu0 %v53_v62  ;;  %219 = vmatpush1.msra.mxu1 %v55_v2 }
  0x47   :  { %182 = vmatmul.mubr.f32.vlgmr.msra.gmra.mxu0 %v52_v1  ;;  %253 = vmatmul.mubr.f32.vlgmr.msra.gmra.mxu1 %v52_v1  ;;  %vm319_vm0 = vcmp.eq.s32.totalorder %v316_v57, 2  ;;  %vm318_vm1 = vcmp.eq.s32.totalorder %v316_v57, 1  ;;  %vm317_vm2 = vcmp.eq.s32.totalorder %v316_v57, 0 }
  0x48   :  { %v320_v58 = vsel %vm319_vm0, 4096.0, %v460_v0 }
  0x49   :  { %v354_v7 = vpop.eup %353 }
  0x4a   :  { %v356_v8 = vpop.eup %355 }
  0x4b   :  { %v358_v9 = vpop.eup %357 }
  0x4c   :  { %v360_v11 = vpop.eup %359 }
 0x107   :  { %v183_v10 = vpop.f32.mrf.mxu0  ;;  %v254_v13 = vpop.f32.mrf.mxu1 }
 0x108   :  { %v264_v12 = vmul.f32 %v354_v7, %v183_v10  ;;  %v268_v15 = vmul.f32 %v356_v8, %v254_v13 }
 0x109   :  { %v185_v14 = vpop.f32.mrf.mxu0  ;;  %v256_v17 = vpop.f32.mrf.mxu1 }
 0x10a   :  { %361 = vlog2.f32 %v264_v12  ;;  %v266_v16 = vmul.f32 %v358_v9, %v185_v14  ;;  %v270_v18 = vmul.f32 %v360_v11, %v256_v17 }
 0x10b   :  { %363 = vlog2.f32 %v268_v15 }
 0x10c   :  { %365 = vlog2.f32 %v266_v16 }
 0x10d   :  { %367 = vlog2.f32 %v270_v18 }
 0x117   :  { %v362_v19 = vpop.eup %361 }
 0x118   :  { %v364_v20 = vpop.eup %363  ;;  %v272_v22 = vmul.f32 0.6931472, %v362_v19 }
 0x119   :  { %v366_v21 = vpop.eup %365  ;;  %v276_v24 = vmul.f32 0.6931472, %v364_v20 }
 0x11a   :  { %v274_v23 = vmul.f32 0.6931472, %v366_v21  ;;  %v368_v25 = vpop.eup %367 }
 0x11b   :  { %v278_v27 = vmul.f32 0.6931472, %v368_v25 }
 0x11c   :  { %v279_v26 = vadd.f32 %v274_v23, %v272_v22 }
 0x11e   :  { %v280_v28 = vadd.f32 %v279_v26, %v276_v24 }
 0x120   :  { %v281_v29 = vadd.f32 %v280_v28, %v278_v27 }
 0x122   :  { %282 = vadd.xlane.f32.xlu0 %v281_v29 }
 0x1ab   :  { %v283_v30 = vpop.xlane.xlu0 %282 }
 0x1ac   :  { %v284_v31 = vrot.slane %v283_v30, 4 }
 0x1ae   :  { %v285_v32 = vadd.f32 %v284_v31, %v283_v30 }
 0x1b0   :  { %v286_v33 = vrot.slane %v285_v32, 2 }
 0x1b2   :  { %v287_v34 = vadd.f32 %v286_v33, %v285_v32 }
 0x1b4   :  { %v288_v35 = vrot.slane %v287_v34, 1 }
 0x1b6   :  { %v289_v36 = vadd.f32 %v288_v35, %v287_v34 }
 0x1b8   :  { %342 = vpush %v289_v36 }
 0x1e9   :  { %s493_s0 = spop %342 }
 0x1ea   :  { %s293_s2 = smul.f32 0.00024414063, %s493_s0  ;;  %v323_v60 = vstv %s493_s0 }
 0x1ec   :  { %v294_v37 = vstv %s293_s2 }
 0x1ed   :  { %v295_v38 = vsub.f32 %v272_v22, %v294_v37  ;;  %v296_v39 = vsub.f32 %v274_v23, %v294_v37  ;;  %v297_v40 = vsub.f32 %v276_v24, %v294_v37  ;;  %v298_v43 = vsub.f32 %v278_v27, %v294_v37 }
 0x1ef   :  { %v299_v41 = vmul.f32 %v295_v38, %v295_v38  ;;  %v300_v42 = vmul.f32 %v296_v39, %v296_v39  ;;  %v301_v44 = vmul.f32 %v297_v40, %v297_v40  ;;  %v302_v46 = vmul.f32 %v298_v43, %v298_v43 }
 0x1f1   :  { %v303_v45 = vadd.f32 %v300_v42, %v299_v41 }
 0x1f3   :  { %v304_v47 = vadd.f32 %v303_v45, %v301_v44 }
 0x1f5   :  { %v305_v48 = vadd.f32 %v304_v47, %v302_v46 }
 0x1f7   :  { %306 = vadd.xlane.f32.xlu0 %v305_v48 }
 0x280   :  { %v307_v49 = vpop.xlane.xlu0 %306 }
 0x281   :  { %v308_v50 = vrot.slane %v307_v49, 4 }
 0x283   :  { %v309_v51 = vadd.f32 %v308_v50, %v307_v49 }
 0x285   :  { %v310_v52 = vrot.slane %v309_v51, 2 }
 0x287   :  { %v311_v53 = vadd.f32 %v310_v52, %v309_v51 }
 0x289   :  { %v312_v54 = vrot.slane %v311_v53, 1 }
 0x28b   :  { %v313_v55 = vadd.f32 %v312_v54, %v311_v53 }
 0x28d   :  { %344 = vpush %v313_v55 }
 0x2be   :  { %s345_s30 = spop %344 }
 0x2bf   :  { %v321_v59 = vstv %s345_s30 }
 0x2c0   :  { %v322_v61 = vsel %vm318_vm1, %v321_v59, %v320_v58 }
 0x2c1   :  { %v324_v62 = vsel %vm317_vm2, %v323_v60, %v322_v61 }
 0x2c2   :  { %325 = vst [vmem:[#allocation8] sm:$0xff] %v324_v62 }
 0x2c3   :  { %440 = shalt.err (!%p437_p5)
}
 0x2c4   :  { %335 = dma.vmem_to_hbm [thread:$0]  %s333_s29, 128, %s504_s3, [#allocation4]  }
 0x2c5   :  { %453 = dma.done.wait [#allocation4], 128  }
 0x2c6   :  { %454 = vsyncadd [#allocation4], 4294967168 }
 0x2c7   :  { %339 = vsyncpa [#allocation3], 1 }
 0x2c8   :  { %340 = vsyncpa [#allocation6], 1 }
 0x2c9   :  { %341 = vsyncpa [#allocation4], 1 }

</bundles_post_ra>
